<compile_context>
chip_gen: v6e
topology: v6e:2x2x1
jax: 0.10.0
libtpu: 0.0.40
codegen_flags: <defaults>
</compile_context>

<pallas_src>
import math

import jax
import jax.numpy as jnp
from jax import lax
from jax.experimental import pallas as pl
from jax.experimental.pallas import tpu as pltpu


# ----------------------------------------------------------------------------
# Pallas kernel: per-sample effective-weight cache + single GEMM + bias
# ----------------------------------------------------------------------------
def _stn_conv2d_kernel(patches_ref, w_ref, hw_ref, bc_ref, out_ref, w_eff_ref):
    # patches_ref: (1, TP, Kd)        compute dtype (bf16 by default)
    # w_ref:       (Kd, 2*Co_pad)     f32, columns = [gen | resp]
    # hw_ref:      (1, 1, Co_pad)     f32 per-sample response scale (padded)
    # bc_ref:      (1, 1, Co_pad)     f32 per-sample combined bias  (padded)
    # out_ref:     (1, TP, Co_pad)
    # w_eff_ref:   (Kd, Co_pad)       compute dtype scratch (per-sample cache)
    co = out_ref.shape[-1]

    # Recompute the per-sample effective weight only on the first spatial tile
    # of each batch sample; it stays cached in VMEM for the remaining tiles.
    @pl.when(pl.program_id(1) == 0)
    def _():
        w = w_ref[...]                                   # (Kd, 2*Co_pad) f32
        gen = w[:, :co]                                  # (Kd, Co_pad)
        resp = w[:, co:]                                 # (Kd, Co_pad)
        w_eff = gen + hw_ref[0] * resp                   # f32 combine
        w_eff_ref[...] = w_eff.astype(w_eff_ref.dtype)

    x = patches_ref[0]                                   # (TP, Kd)
    acc = jnp.dot(x, w_eff_ref[...],
                  preferred_element_type=jnp.float32)    # (TP, Co_pad) f32
    out_ref[0] = (acc + bc_ref[0]).astype(out_ref.dtype)


# ----------------------------------------------------------------------------
# Glue: im2col, parameter prep, pallas_call, NCHW re-layout
# ----------------------------------------------------------------------------
def _round_up(x, m):
    return ((x + m - 1) // m) * m


def _im2col(x, K, stride, padding, dilation):
    """x: (B, C, H, W) -> (B, H_out*W_out, C*K*K) with (c, kh, kw) order."""
    B, C, H, W = x.shape
    x_pad = jnp.pad(x, ((0, 0), (0, 0), (padding, padding), (padding, padding)))
    H_out = (H + 2 * padding - dilation * (K - 1) - 1) // stride + 1
    W_out = (W + 2 * padding - dilation * (K - 1) - 1) // stride + 1
    cols = []
    for kh in range(K):
        for kw in range(K):
            h0 = kh * dilation
            w0 = kw * dilation
            patch = x_pad[:, :,
                          h0:h0 + stride * (H_out - 1) + 1:stride,
                          w0:w0 + stride * (W_out - 1) + 1:stride]   # (B,C,Ho,Wo)
            cols.append(patch)
    cols = jnp.stack(cols, axis=-1)                  # (B, C, Ho, Wo, K*K)
    cols = cols.transpose(0, 2, 3, 1, 4)             # (B, Ho, Wo, C, K*K)
    return cols.reshape(B, H_out * W_out, C * K * K), H_out, W_out


def stn_conv2d_forward(x, h_net, params, *, kernel_size, stride=1, padding=0,
                       dilation=1, compute_dtype=jnp.bfloat16):
    """Pallas implementation of StnConv2d.forward (groups=1, bias=True)."""
    B, C_in, H, W = x.shape
    K = kernel_size
    W_gen, b_gen, W_resp, b_resp, W_hyper = (
        params["general_weight"], params["general_bias"],
        params["response_weight"], params["response_bias"],
        params["hyper_weight"])
    C_out = W_gen.shape[0]

    # Cast x to the compute dtype before im2col: halves the HBM footprint of
    # the K^2-expanded patch tensor (element-wise cast commutes with gather).
    patches, H_out, W_out = _im2col(x.astype(compute_dtype), K, stride,
                                    padding, dilation)
    P = H_out * W_out
    Kd = C_in * K * K

    # Lane-dense padded output channel count.
    Co_pad = _round_up(C_out, 128)

    in_bytes = jnp.dtype(compute_dtype).itemsize
    out_bytes = jnp.dtype(x.dtype).itemsize

    # Pick TP: biggest spatial tile whose double-buffered footprint stays
    # under ~12 MiB (safe for v5e's 16 MiB scoped default and v7x's 64 MiB
    # physical VMEM), capped at 2048 rows, multiple of 8.
    budget = 12 * 1024 * 1024
    fixed = (2 * Kd * 2 * Co_pad * 4            # f32 [gen|resp] weight (x2 bufs)
             + Kd * Co_pad * in_bytes           # W_eff scratch
             + 4 * 2 * Co_pad * 4)              # per-sample scale/bias bufs
    per_row = 2 * Kd * in_bytes + 2 * Co_pad * out_bytes  # patches + output (x2)
    TP = max(8, min(2048, (budget - fixed) // max(per_row, 1)))
    TP = min(TP, _round_up(P, 8))
    TP = max(8, (TP // 8) * 8)
    P_pad = _round_up(P, TP)

    if P_pad != P:
        patches = jnp.pad(patches, ((0, 0), (0, P_pad - P), (0, 0)))

    # Fused conv weight: (C_out, C_in, K, K) -> (Kd, Co_pad), gen | resp cols.
    # Kept f32: it is DMA'd once (constant index_map) and combined in f32.
    def _prep_w(w):
        w2 = w.reshape(C_out, Kd).T.astype(jnp.float32)         # (Kd, C_out)
        return jnp.pad(w2, ((0, 0), (0, Co_pad - C_out)))
    w_cat = jnp.concatenate([_prep_w(W_gen), _prep_w(W_resp)], axis=1)

    # Hyper linear + bias combine hoisted to the wrapper (tiny, XLA handles it).
    linear = h_net.astype(jnp.float32) @ W_hyper.astype(jnp.float32).T   # (B, 2*C_out)
    hyper_w = linear[:, :C_out]                                          # (B, C_out)
    hyper_b = linear[:, C_out:]                                          # (B, C_out)
    b_comb = b_gen[None, :].astype(jnp.float32) + hyper_b * b_resp[None, :]
    hyper_w = jnp.pad(hyper_w, ((0, 0), (0, Co_pad - C_out))).reshape(B, 1, Co_pad)
    b_comb = jnp.pad(b_comb, ((0, 0), (0, Co_pad - C_out))).reshape(B, 1, Co_pad)

    grid = (B, P_pad // TP)
    out = pl.pallas_call(
        _stn_conv2d_kernel,
        out_shape=jax.ShapeDtypeStruct((B, P_pad, Co_pad), x.dtype),
        grid_spec=pltpu.PrefetchScalarGridSpec(
            num_scalar_prefetch=0,
            grid=grid,
            in_specs=[
                pl.BlockSpec((1, TP, Kd), lambda b, p: (b, p, 0)),
                pl.BlockSpec((Kd, 2 * Co_pad), lambda b, p: (0, 0)),
                pl.BlockSpec((1, 1, Co_pad), lambda b, p: (b, 0, 0)),
                pl.BlockSpec((1, 1, Co_pad), lambda b, p: (b, 0, 0)),
            ],
            out_specs=pl.BlockSpec((1, TP, Co_pad), lambda b, p: (b, p, 0)),
            scratch_shapes=[pltpu.VMEM((Kd, Co_pad), compute_dtype)],
        ),
        compiler_params=pltpu.CompilerParams(
            dimension_semantics=("parallel", "arbitrary")),
    )(patches, w_cat, hyper_w, b_comb)

    # Strip padding, (B, Ho*Wo, C_out) -> NCHW.
    out = out[:, :P, :C_out]
    # TODO(synk): if the consumer accepts NHWC, skip this transpose (one full
    # extra HBM pass over the output).
    return out.reshape(B, H_out, W_out, C_out).transpose(0, 3, 1, 2)


# ----------------------------------------------------------------------------
# Pure-JAX reference (for correctness check)
# ----------------------------------------------------------------------------
def stn_conv2d_reference(x, h_net, params, *, stride=1, padding=0, dilation=1):
    W_gen, b_gen, W_resp, b_resp, W_hyper = (
        params["general_weight"], params["general_bias"],
        params["response_weight"], params["response_bias"],
        params["hyper_weight"])
    C_out = W_gen.shape[0]

    def conv(w):
        return lax.conv_general_dilated(
            x, w, window_strides=(stride, stride),
            padding=[(padding, padding), (padding, padding)],
            rhs_dilation=(dilation, dilation),
            dimension_numbers=("NCHW", "OIHW", "NCHW"))

    out = conv(W_gen) + b_gen[None, :, None, None]
    linear_hyper = h_net @ W_hyper.T
    hyper_w = linear_hyper[:, :C_out][:, :, None, None]
    hyper_b = linear_hyper[:, C_out:]
    resp = conv(W_resp) * hyper_w
    resp = resp + (hyper_b * b_resp[None, :])[:, :, None, None]
    return out + resp


# ----------------------------------------------------------------------------
# Demo / test
# ----------------------------------------------------------------------------
if __name__ == "__main__":
    B, C_in, H, W = 2, 4, 16, 16
    C_out, K, NH = 8, 3, 8
    stride, padding, dilation = 1, 1, 1

    key = jax.random.PRNGKey(0)
    k = jax.random.split(key, 8)

    # Deterministic parameter init (shapes from StnConv2d.__init__).
    # Note: the PyTorch module zero-inits hyper_bottleneck.weight; we use
    # small nonzero values here so the response branch is actually exercised.
    fan_in = C_in * K * K
    bound_w = math.sqrt(6.0 / fan_in) / math.sqrt(6.0)
    bound_b = 1.0 / math.sqrt(fan_in)
    params = {
        "general_weight": jax.random.uniform(k[0], (C_out, C_in, K, K),
                                             jnp.float32, -bound_w, bound_w),
        "response_weight": jax.random.uniform(k[1], (C_out, C_in, K, K),
                                              jnp.float32, -bound_w, bound_w),
        "general_bias": jax.random.uniform(k[2], (C_out,), jnp.float32,
                                           -bound_b, bound_b),
        "response_bias": jax.random.uniform(k[3], (C_out,), jnp.float32,
                                            -bound_b, bound_b),
        "hyper_weight": 0.1 * jax.random.normal(k[4], (2 * C_out, NH),
                                                jnp.float32),
    }

    x = jax.random.normal(k[5], (B, C_in, H, W), jnp.float32)
    h_net = jax.random.normal(k[6], (B, NH), jnp.float32)

    ref = stn_conv2d_reference(x, h_net, params, stride=stride,
                               padding=padding, dilation=dilation)

    # Default bf16 GEMM path (perf config) -- loosened tolerance.
    out = stn_conv2d_forward(x, h_net, params, kernel_size=K, stride=stride,
                             padding=padding, dilation=dilation)
    out = jax.block_until_ready(out)
    assert out.shape == (B, C_out, H, W), out.shape
    assert jnp.allclose(out, ref, atol=2e-2, rtol=2e-2), \
        float(jnp.max(jnp.abs(out - ref)))

    # f32 GEMM path -- tight tolerance sanity check of the kernel structure.
    out_f32 = stn_conv2d_forward(x, h_net, params, kernel_size=K,
                                 stride=stride, padding=padding,
                                 dilation=dilation,
                                 compute_dtype=jnp.float32)
    out_f32 = jax.block_until_ready(out_f32)
    assert jnp.allclose(out_f32, ref, atol=1e-4, rtol=1e-4), \
        float(jnp.max(jnp.abs(out_f32 - ref)))

    print("KERNEL_OK")
</pallas_src>

<mosaic_0001>
module attributes {stable_mosaic.version = 11 : i64} {
  func.func @_stn_conv2d_kernel(%arg0: i32, %arg1: i32, %arg2: memref<1x256x36xbf16, #tpu.memory_space<vmem>>, %arg3: memref<36x256xf32, #tpu.memory_space<vmem>>, %arg4: memref<1x1x128xf32, #tpu.memory_space<vmem>>, %arg5: memref<1x1x128xf32, #tpu.memory_space<vmem>>, %arg6: memref<1x256x128xf32, #tpu.memory_space<vmem>>, %arg7: memref<36x128xbf16, #tpu.memory_space<vmem>>) attributes {dimension_semantics = [#tpu.dimension_semantics<parallel>, #tpu.dimension_semantics<arbitrary>], iteration_bounds = array<i64: 2, 1>, scalar_prefetch = 0 : i64, scratch_operands = 1 : i64, tpu.core_type = #tpu.core_type<tc>, window_params = [{transform_indices = @transform_0, window_bounds = array<i64: 1, 256, 36>}, {pipeline_mode = #tpu.pipeline_mode<synchronous>, transform_indices = @transform_1, window_bounds = array<i64: 36, 256>}, {transform_indices = @transform_2, window_bounds = array<i64: 1, 1, 128>}, {transform_indices = @transform_3, window_bounds = array<i64: 1, 1, 128>}, {transform_indices = @transform_4, window_bounds = array<i64: 1, 256, 128>}]} {
    %c0_i32 = arith.constant 0 : i32
    %0 = arith.cmpi eq, %arg1, %c0_i32 : i32
    %1 = arith.extui %0 : i1 to i32
    %c0_i32_0 = arith.constant 0 : i32
    %2 = arith.cmpi ne, %1, %c0_i32_0 : i32
    scf.if %2 {
      %c0_11 = arith.constant 0 : index
      %c0_12 = arith.constant 0 : index
      %14 = vector.load %arg3[%c0_11, %c0_12] : memref<36x256xf32, #tpu.memory_space<vmem>>, vector<36x256xf32>
      %15 = vector.extract_strided_slice %14 {offsets = [0, 0], sizes = [36, 128], strides = [1, 1]} : vector<36x256xf32> to vector<36x128xf32>
      %16 = vector.extract_strided_slice %14 {offsets = [0, 128], sizes = [36, 128], strides = [1, 1]} : vector<36x256xf32> to vector<36x128xf32>
      %c0_13 = arith.constant 0 : index
      %c0_14 = arith.constant 0 : index
      %c0_15 = arith.constant 0 : index
      %17 = vector.load %arg4[%c0_13, %c0_14, %c0_15] : memref<1x1x128xf32, #tpu.memory_space<vmem>>, vector<1x1x128xf32>
      %18 = vector.shape_cast %17 : vector<1x1x128xf32> to vector<1x128xf32>
      %19 = vector.broadcast %18 : vector<1x128xf32> to vector<36x128xf32>
      %20 = arith.mulf %19, %16 : vector<36x128xf32>
      %21 = arith.addf %15, %20 : vector<36x128xf32>
      %22 = arith.truncf %21 : vector<36x128xf32> to vector<36x128xbf16>
      %c0_16 = arith.constant 0 : index
      %c0_17 = arith.constant 0 : index
      %23 = vector.load %arg7[%c0_16, %c0_17] : memref<36x128xbf16, #tpu.memory_space<vmem>>, vector<36x128xbf16>
      tpu.vector_store %arg7[%c0_16, %c0_17], %22 {strides = array<i32>} : memref<36x128xbf16, #tpu.memory_space<vmem>>, vector<36x128xbf16>,
    } else {
    }
    %c0 = arith.constant 0 : index
    %c0_1 = arith.constant 0 : index
    %c0_2 = arith.constant 0 : index
    %3 = vector.load %arg2[%c0, %c0_1, %c0_2] : memref<1x256x36xbf16, #tpu.memory_space<vmem>>, vector<1x256x36xbf16>
    %4 = vector.shape_cast %3 : vector<1x256x36xbf16> to vector<256x36xbf16>
    %c0_3 = arith.constant 0 : index
    %c0_4 = arith.constant 0 : index
    %5 = vector.load %arg7[%c0_3, %c0_4] : memref<36x128xbf16, #tpu.memory_space<vmem>>, vector<36x128xbf16>
    %cst = arith.constant dense<0.000000e+00> : vector<256x128xf32>
    %6 = tpu.matmul %4, %5, %cst {dimension_numbers = #tpu.dot_dimension_numbers<[1], [0], [0], [1], [0, 0, 1, 1], [], []>} : vector<256x36xbf16>, vector<36x128xbf16>, vector<256x128xf32> -> vector<256x128xf32>
    %c0_5 = arith.constant 0 : index
    %c0_6 = arith.constant 0 : index
    %c0_7 = arith.constant 0 : index
    %7 = vector.load %arg5[%c0_5, %c0_6, %c0_7] : memref<1x1x128xf32, #tpu.memory_space<vmem>>, vector<1x1x128xf32>
    %8 = vector.shape_cast %7 : vector<1x1x128xf32> to vector<1x128xf32>
    %9 = vector.broadcast %8 : vector<1x128xf32> to vector<256x128xf32>
    %10 = arith.addf %6, %9 : vector<256x128xf32>
    %c0_8 = arith.constant 0 : index
    %c0_9 = arith.constant 0 : index
    %c0_10 = arith.constant 0 : index
    %11 = vector.load %arg6[%c0_8, %c0_9, %c0_10] : memref<1x256x128xf32, #tpu.memory_space<vmem>>, vector<1x256x128xf32>
    %12 = vector.shape_cast %11 : vector<1x256x128xf32> to vector<256x128xf32>
    %13 = vector.shape_cast %10 : vector<256x128xf32> to vector<1x256x128xf32>
    tpu.vector_store %arg6[%c0_8, %c0_9, %c0_10], %13 {strides = array<i32>} : memref<1x256x128xf32, #tpu.memory_space<vmem>>, vector<1x256x128xf32>,
    return
  }
  func.func @transform_0(%arg0: i32, %arg1: i32) -> (i32, i32, i32) {
    %c0_i32 = arith.constant 0 : i32
    %c0_i32_0 = arith.constant 0 : i32
    return %arg0, %arg1, %c0_i32 : i32, i32, i32
  }
  func.func @transform_1(%arg0: i32, %arg1: i32) -> (i32, i32) {
    %c0_i32 = arith.constant 0 : i32
    %c0_i32_0 = arith.constant 0 : i32
    %c0_i32_1 = arith.constant 0 : i32
    return %c0_i32, %c0_i32_0 : i32, i32
  }
  func.func @transform_2(%arg0: i32, %arg1: i32) -> (i32, i32, i32) {
    %c0_i32 = arith.constant 0 : i32
    %c0_i32_0 = arith.constant 0 : i32
    %c0_i32_1 = arith.constant 0 : i32
    return %arg0, %c0_i32, %c0_i32_0 : i32, i32, i32
  }
  func.func @transform_3(%arg0: i32, %arg1: i32) -> (i32, i32, i32) {
    %c0_i32 = arith.constant 0 : i32
    %c0_i32_0 = arith.constant 0 : i32
    %c0_i32_1 = arith.constant 0 : i32
    return %arg0, %c0_i32, %c0_i32_0 : i32, i32, i32
  }
  func.func @transform_4(%arg0: i32, %arg1: i32) -> (i32, i32, i32) {
    %c0_i32 = arith.constant 0 : i32
    %c0_i32_0 = arith.constant 0 : i32
    return %arg0, %arg1, %c0_i32 : i32, i32, i32
  }
}

</mosaic_0001>

<bundles_post_ra>
// kernel: tpu_custom_call.1
= control target key start
LH: loop header
LB: loop body
LE: loop exit
PB: predicated region body
PF: predicated region fallthrough
CT: control target
= control target key end

     0   :  { %9 = vsyncpa [#allocation4], 0  ;;  %s1393_s0 = inlined_call_operand.vmem [shape: bf16[2,256,36], index: 0, kind: input, shape index: {}]   ;;  %s1394_s1 = inlined_call_operand.vmem [shape: f32[36,256], index: 1, kind: input, shape index: {}]   ;;  %s1395_s2 = inlined_call_operand.vmem [shape: f32[2,1,128], index: 2, kind: input, shape index: {}]   ;;  %s1396_s3 = inlined_call_operand.vmem [shape: f32[2,1,128], index: 3, kind: input, shape index: {}]   ;;  %s1397_s4 = inlined_call_operand.hbm [shape: f32[2,256,128], index: 4, kind: output, shape index: {}]  }
   0x1   :  { %11 = vsyncpa [#allocation4 + $0x1], 0  ;;  %s1131_s15 = smov 0   ;;  %s1133_s16 = smov 0  }
   0x2   :  { %s1135_s17 = smov 0   ;;  %s1137_s18 = smov 0  }
   0x3   :  { %s1139_s19 = smov 0   ;;  %s1141_s20 = smov 0  }
   0x4 LB: > { %s811_s21 = sadd.s32 4294967295, %s1101_s20   ;;  %s812_s22 = sadd.s32 4294967294, %s1101_s20   ;;  %s1101_s20 = sphi %s1141_s20, %s17_s20   ;;  %s1097_s19 = sphi %s1139_s19, %s1404_s19   ;;  %s1093_s18 = sphi %s1137_s18, %s1403_s18   ;;  %s1089_s17 = sphi %s1135_s17, %s1402_s17   ;;  %s1085_s16 = sphi %s1133_s16, %s1401_s16   ;;  %s1081_s15 = sphi %s1131_s15, %s1400_s15  }
   0x5   : > { %s29_s23 = sadd.s32 1, %s1097_s19  ;;  %s139_s24 = sadd.s32 1, %s1089_s17 }
   0x6   : > { %p31_p0 = scmp.ge.s32.totalorder %s29_s23, 2  ;;  %p149_p1 = scmp.ne.s32.totalorder %s1089_s17, %s1085_s16 }
   0x7   : > { %p150_p2 = scmp.eq.s32.totalorder %s811_s21, 1  ;;  %p155_p3 = scmp.ne.s32.totalorder %s1085_s16, %s1081_s15 }
   0x8   : > { %s1406_s23 = smov (%p31_p0, %s29_s23), 0  ;;  %p156_p5 = scmp.eq.s32.totalorder %s812_s22, 1 }
   0x9   : > { %p1171_p4 = por %p150_p2, %p149_p1  ;;  %s134_s26 = ssub.s32 %s1097_s19, %s1406_s23 }
   0xa   : > { %p815_p6 = scmp.ge.s32.totalorder %s1101_s20, 1  ;;  %p137_p7 = scmp.eq.s32.totalorder %s134_s26, 0 }
   0xb   : > { %p1178_p8 = por %p156_p5, %p155_p3  ;;  %p202_p9 = scmp.lt.s32.totalorder %s1101_s20, 3 }
   0xc   : > { %s1184_s28 = scalar_select %p137_p7, %s1089_s17, %s139_s24  }
   0xd   : > { %p203_p10 = pnand %p815_p6, %p202_p9 }
   0xe   : > { %p239_p11 = scmp.lt.s32.totalorder (!%p203_p10), %s1093_s18, 1  ;;  %s1103_s13 = smov (!%p203_p10), [#allocation3]  }
   0xf   : > { %206 = sbr.rel (%p203_p10) target bundleno = 289 (0x121), region = 36  ;;  %s1029_s14 = sshll.u32 (!%p203_p10), %s1103_s13, 4  ;;  %s1030_s14 = int_to_ptr.vmem [resolvable:$false] %s1029_s14 }
  0x10   : > { %s1031_s22 = scalar_lea.vmem (!%p203_p10), %s1030_s14, 8192 }
  0x14   : > { %s1188_s29 = scalar_select %p239_p11, %s1093_s18, 1  ;;  %v269_v0 = vld [vmem:[%s1394_s1 + $0x48] sm:$0xf]  ;;  %v267_v2 = vld [vmem:[%s1394_s1 + $0x38] sm:$0xff]  ;;  %v268_v4 = vld [vmem:[%s1394_s1 + $0x40] sm:$0xf] }
  0x15   : > { %v265_v1 = vld [vmem:[%s1394_s1 + $0x28] sm:$0xff]  ;;  %v264_v5 = vld [vmem:[%s1394_s1 + $0x20] sm:$0xff]  ;;  %v263_v6 = vld [vmem:[%s1394_s1 + $0x18] sm:$0xff]  ;;  %vm452_vm0 = vcmask 293888   ;;  %vm501_vm1 = vcmask 1041408  }
  0x16   : > { %v261_v3 = vld [vmem:[%s1394_s1 + $0x8] sm:$0xff]  ;;  %s866_s12 = sshll.u32 %s1188_s29, 7  ;;  %s250_s21 = scalar_lea.vmem %s1395_s2, %s1188_s29  ;;  %v266_v8 = vld [vmem:[%s1394_s1 + $0x30] sm:$0xff]  ;;  %v260_v9 = vld [vmem:[%s1394_s1] sm:$0xff] }
  0x17   : > { %s1219_s9 = scalar_lea.vmem %s1393_s0, %s866_s12  ;;  %v819_v7 = vld [vmem:[%s250_s21] ss:$0 sm:$0xff]  ;;  %v262_v13 = vld [vmem:[%s1394_s1 + $0x10] sm:$0xff]  ;;  %s235_s12 = sand.u32 1, %s1085_s16  }
  0x18   : > { %v281_v10 = vmul.f32 %v819_v7, %v269_v0  ;;  %v279_v11 = vmul.f32 %v819_v7, %v265_v1  ;;  %v280_v12 = vmul.f32 %v819_v7, %v267_v2  ;;  %v277_v14 = vmul.f32 %v819_v7, %v261_v3  ;;  %v1009_v16 = vld [vmem:[%s1219_s9] sm:$0xff]   ;;  %v1011_v30 = vld [vmem:[%s1219_s9 + $0x8] sm:$0xff]   ;;  %v1013_v32 = vld [vmem:[%s1219_s9 + $0x10] sm:$0xff]   ;;  %s253_s30 = scalar_lea.vmem %s1396_s3, %s1188_s29  ;;  %s816_s5 = sshll.u32 %s235_s12, 8 }
  0x19   : > { %v278_v15 = vmul.f32 %v819_v7, %v263_v6  ;;  %v1010_v21 = vld [vmem:[%s1219_s9 + $0x40] sm:$0xff]   ;;  %909 = vmatprep.mubr.msk.bf16.mxu0 %vm452_vm0, %v1009_v16  ;;  %v1012_v31 = vld [vmem:[%s1219_s9 + $0x48] sm:$0xff]   ;;  %v1014_v33 = vld [vmem:[%s1219_s9 + $0x50] sm:$0xff]   ;;  %s1273_s6 = scalar_lea.vmem [#allocation3], %s816_s5  ;;  %s872_s29 = sshll.u32 %s1093_s18, 12 }
  0x1a   : > { %v286_v17 = vadd.f32 %v281_v10, %v268_v4  ;;  %v284_v18 = vadd.f32 %v279_v11, %v264_v5  ;;  %v285_v19 = vadd.f32 %v280_v12, %v266_v8  ;;  %v282_v20 = vadd.f32 %v277_v14, %v260_v9  ;;  %925 = vmatprep.mubr.msk.bf16.mxu1 %vm452_vm0, %v1010_v21  ;;  %v1015_v34 = vld [vmem:[%s1219_s9 + $0x18] sm:$0xff]   ;;  %v1017_v36 = vld [vmem:[%s1219_s9 + $0x20] sm:$0xff]   ;;  %v1019_v38 = vld [vmem:[%s1219_s9 + $0x28] sm:$0xff]   ;;  %s714_s7 = sshll.u32 %s1273_s6, 4  ;;  %s1336_s10 = scalar_lea.hbm %s1397_s4, %s872_s29  ;;  %s1338_s7 = int_to_ptr.vmem [resolvable:$true] %s714_s7 }
  0x1b   : > { %v283_v22 = vadd.f32 %v278_v15, %v262_v13  ;;  %v1016_v35 = vld [vmem:[%s1219_s9 + $0x58] sm:$0xff]   ;;  %v1018_v37 = vld [vmem:[%s1219_s9 + $0x60] sm:$0xff]   ;;  %v1020_v39 = vld [vmem:[%s1219_s9 + $0x68] sm:$0xff]   ;;  %s1348_s18 = scalar_lea.sflag [#allocation4], %s235_s12  ;;  %s1025_s11 = scalar_lea.vmem %s1338_s7, 4096 }
  0x1c   : > { %v871_v23 = vpack.c.bf16 %v286_v17, %v286_v17  ;;  %v881_v24 = vpack.c.bf16 %v285_v19, %v284_v18  ;;  %v1021_v40 = vld [vmem:[%s1219_s9 + $0x30] sm:$0xff]   ;;  %v1023_v42 = vld [vmem:[%s1219_s9 + $0x38] sm:$0xff]   ;;  %v1269_v44 = vld [vmem:[%s253_s30] ss:$0 sm:$0xff]  ;;  %p1026_p12 = scmp.ne.s32.totalorder %s1338_s7, %s1025_s11  ;;  %p1032_p1 = scmp.lt.s32.totalorder %s1338_s7, %s1030_s14 }
  0x1d   : > { %v876_v25 = vpack.c.bf16 %v283_v22, %v282_v20  ;;  %v1022_v41 = vld [vmem:[%s1219_s9 + $0x70] sm:$0xff]   ;;  %v1024_v43 = vld [vmem:[%s1219_s9 + $0x78] sm:$0xff]   ;;  %p1033_p2 = scmp.lt.s32.totalorder %s1031_s22, %s1025_s11 }
  0x1e   : > { %312 = vst [vmem:[#allocation2 + $0x10] sm:$0x3] %v871_v23  ;;  %883 = vst [vmem:[#allocation2 + $0x8] sm:$0xff] %v881_v24   ;;  %p1027_p13 = pnand %p1026_p12, %p1171_p4 }
  0x1f   : > { %877 = vst [vmem:[#allocation2] sm:$0xff] %v876_v25   ;;  %p1034_p3 = por %p1033_p2, %p1032_p1 }
  0x20   : > { %p1028_p0 = pneg %p1027_p13 }
  0x22   : > { %p1035_p5 = pnand %p1034_p3, %p1028_p0 }
  0x25   : > { %v1006_v26 = vld [vmem:[#allocation2 + $0x10] ss:$0 sps:$4 sm:$0x33]   ;;  %v1007_v27 = vld [vmem:[#allocation2 + $0x8] sm:$0xff]  }
  0x26   : > { %947 = vmatprep.subr.msk.bf16.mxu0 %vm501_vm1, %v1006_v26  ;;  %948 = vmatprep.subr.msk.bf16.mxu1 %vm501_vm1, %v1006_v26  ;;  %v503_v28 = vsel %vm501_vm1, %v1006_v26, 0  ;;  %v1008_v29 = vld [vmem:[#allocation2] sm:$0xff]  }
  0x27   : > { %904 = vmatpush3.bf16.msra.mxu0 %v503_v28  ;;  %944 = vmatpush3.bf16.msra.mxu1 %v503_v28 }
  0x28   : > { %905 = vmatprep.subr.bf16.mxu0 %v1007_v27  ;;  %942 = vmatprep.subr.bf16.mxu1 %v1007_v27 }
  0x2b   : > { %906 = vmatpush3.bf16.msra.mxu0 %v1007_v27  ;;  %945 = vmatpush3.bf16.msra.mxu1 %v1007_v27 }
  0x2c   : > { %907 = vmatprep.subr.bf16.mxu0 %v1008_v29  ;;  %943 = vmatprep.subr.bf16.mxu1 %v1008_v29 }
  0x2f   : > { %908 = vmatpush3.bf16.msra.mxu0 %v1008_v29  ;;  %946 = vmatpush3.bf16.msra.mxu1 %v1008_v29 }
  0x32   : > { %910 = vmatmul.mubr.msk.bf16.vlgmr.msra.gmra.mxu0 %vm452_vm0, %v1011_v30  ;;  %926 = vmatmul.mubr.msk.bf16.vlgmr.msra.gmra.mxu1 %vm452_vm0, %v1012_v31 }
  0x33   : > { %913 = vmatprep.mubr.msk.bf16.mxu0 %vm452_vm0, %v1013_v32  ;;  %929 = vmatprep.mubr.msk.bf16.mxu1 %vm452_vm0, %v1014_v33 }
  0x3a   : > { %914 = vmatmul.mubr.msk.bf16.gmra.mxu0 %vm452_vm0, %v1015_v34  ;;  %930 = vmatmul.mubr.msk.bf16.gmra.mxu1 %vm452_vm0, %v1016_v35 }
  0x3b   : > { %917 = vmatprep.mubr.msk.bf16.mxu0 %vm452_vm0, %v1017_v36  ;;  %933 = vmatprep.mubr.msk.bf16.mxu1 %vm452_vm0, %v1018_v37 }
  0x42   : > { %918 = vmatmul.mubr.msk.bf16.gmra.mxu0 %vm452_vm0, %v1019_v38  ;;  %934 = vmatmul.mubr.msk.bf16.gmra.mxu1 %vm452_vm0, %v1020_v39 }
  0x43   : > { %921 = vmatprep.mubr.msk.bf16.mxu0 %vm452_vm0, %v1021_v40  ;;  %937 = vmatprep.mubr.msk.bf16.mxu1 %vm452_vm0, %v1022_v41 }
  0x4a   : > { %922 = vmatmul.mubr.msk.bf16.gmra.mxu0 %vm452_vm0, %v1023_v42  ;;  %938 = vmatmul.mubr.msk.bf16.gmra.mxu1 %vm452_vm0, %v1024_v43 }
  0xf2   : > { %v911_v45 = vpop.f32.mrf.mxu0  ;;  %v927_v46 = vpop.f32.mrf.mxu1 }
  0xf3   : > { %v548_v47 = vadd.f32 %v911_v45, %v1269_v44  ;;  %v612_v48 = vadd.f32 %v927_v46, %v1269_v44 }
  0xf4   : > { %v539_v49 = vpop.f32.mrf.mxu0  ;;  %v603_v50 = vpop.f32.mrf.mxu1 }
  0xf5   : > { %668 = vst [vmem:[%s1273_s6 + $0x10] sm:$0xff] %v548_v47  ;;  %684 = vst [vmem:[%s1273_s6 + $0x90] sm:$0xff] %v612_v48  ;;  %v540_v51 = vadd.f32 %v1269_v44, %v539_v49  ;;  %v604_v52 = vadd.f32 %v1269_v44, %v603_v50 }
  0xf6   : > { %v912_v53 = vpop.f32.mrf.mxu0  ;;  %v928_v54 = vpop.f32.mrf.mxu1 }
  0xf7   : > { %666 = vst [vmem:[%s1273_s6] sm:$0xff] %v540_v51  ;;  %682 = vst [vmem:[%s1273_s6 + $0x80] sm:$0xff] %v604_v52  ;;  %v551_v55 = vadd.f32 %v912_v53, %v1269_v44  ;;  %v615_v56 = vadd.f32 %v928_v54, %v1269_v44 }
  0xf8   : > { %v542_v57 = vpop.f32.mrf.mxu0  ;;  %v606_v58 = vpop.f32.mrf.mxu1 }
  0xf9   : > { %669 = vst [vmem:[%s1273_s6 + $0x18] sm:$0xff] %v551_v55  ;;  %685 = vst [vmem:[%s1273_s6 + $0x98] sm:$0xff] %v615_v56  ;;  %v543_v59 = vadd.f32 %v1269_v44, %v542_v57  ;;  %v607_v60 = vadd.f32 %v1269_v44, %v606_v58 }
  0xfa   : > { %v915_v61 = vpop.f32.mrf.mxu0  ;;  %v931_v62 = vpop.f32.mrf.mxu1 }
  0xfb   : > { %667 = vst [vmem:[%s1273_s6 + $0x8] sm:$0xff] %v543_v59  ;;  %683 = vst [vmem:[%s1273_s6 + $0x88] sm:$0xff] %v607_v60  ;;  %v564_v63 = vadd.f32 %v915_v61, %v1269_v44  ;;  %v628_v0 = vadd.f32 %v931_v62, %v1269_v44 }
  0xfc   : > { %v555_v1 = vpop.f32.mrf.mxu0  ;;  %v619_v2 = vpop.f32.mrf.mxu1 }
  0xfd   : > { %672 = vst [vmem:[%s1273_s6 + $0x30] sm:$0xff] %v564_v63  ;;  %688 = vst [vmem:[%s1273_s6 + $0xb0] sm:$0xff] %v628_v0  ;;  %v556_v3 = vadd.f32 %v1269_v44, %v555_v1  ;;  %v620_v4 = vadd.f32 %v1269_v44, %v619_v2 }
  0xfe   : > { %v916_v5 = vpop.f32.mrf.mxu0  ;;  %v932_v6 = vpop.f32.mrf.mxu1 }
  0xff   : > { %670 = vst [vmem:[%s1273_s6 + $0x20] sm:$0xff] %v556_v3  ;;  %686 = vst [vmem:[%s1273_s6 + $0xa0] sm:$0xff] %v620_v4  ;;  %v567_v7 = vadd.f32 %v916_v5, %v1269_v44  ;;  %v631_v8 = vadd.f32 %v932_v6, %v1269_v44 }
 0x100   : > { %v558_v9 = vpop.f32.mrf.mxu0  ;;  %v622_v10 = vpop.f32.mrf.mxu1 }
 0x101   : > { %673 = vst [vmem:[%s1273_s6 + $0x38] sm:$0xff] %v567_v7  ;;  %689 = vst [vmem:[%s1273_s6 + $0xb8] sm:$0xff] %v631_v8  ;;  %v559_v11 = vadd.f32 %v1269_v44, %v558_v9  ;;  %v623_v12 = vadd.f32 %v1269_v44, %v622_v10 }
 0x102   : > { %v919_v13 = vpop.f32.mrf.mxu0  ;;  %v935_v14 = vpop.f32.mrf.mxu1 }
 0x103   : > { %671 = vst [vmem:[%s1273_s6 + $0x28] sm:$0xff] %v559_v11  ;;  %687 = vst [vmem:[%s1273_s6 + $0xa8] sm:$0xff] %v623_v12  ;;  %v580_v15 = vadd.f32 %v919_v13, %v1269_v44  ;;  %v644_v16 = vadd.f32 %v935_v14, %v1269_v44 }
 0x104   : > { %v571_v17 = vpop.f32.mrf.mxu0  ;;  %v635_v18 = vpop.f32.mrf.mxu1 }
 0x105   : > { %676 = vst [vmem:[%s1273_s6 + $0x50] sm:$0xff] %v580_v15  ;;  %692 = vst [vmem:[%s1273_s6 + $0xd0] sm:$0xff] %v644_v16  ;;  %v572_v19 = vadd.f32 %v1269_v44, %v571_v17  ;;  %v636_v20 = vadd.f32 %v1269_v44, %v635_v18 }
 0x106   : > { %v920_v21 = vpop.f32.mrf.mxu0  ;;  %v936_v22 = vpop.f32.mrf.mxu1 }
 0x107   : > { %674 = vst [vmem:[%s1273_s6 + $0x40] sm:$0xff] %v572_v19  ;;  %690 = vst [vmem:[%s1273_s6 + $0xc0] sm:$0xff] %v636_v20  ;;  %v583_v23 = vadd.f32 %v920_v21, %v1269_v44  ;;  %v647_v24 = vadd.f32 %v936_v22, %v1269_v44 }
 0x108   : > { %v574_v25 = vpop.f32.mrf.mxu0  ;;  %v638_v26 = vpop.f32.mrf.mxu1 }
 0x109   : > { %677 = vst [vmem:[%s1273_s6 + $0x58] sm:$0xff] %v583_v23  ;;  %693 = vst [vmem:[%s1273_s6 + $0xd8] sm:$0xff] %v647_v24  ;;  %v575_v27 = vadd.f32 %v1269_v44, %v574_v25  ;;  %v639_v28 = vadd.f32 %v1269_v44, %v638_v26 }
 0x10a   : > { %v923_v29 = vpop.f32.mrf.mxu0  ;;  %v939_v30 = vpop.f32.mrf.mxu1 }
 0x10b   : > { %675 = vst [vmem:[%s1273_s6 + $0x48] sm:$0xff] %v575_v27  ;;  %691 = vst [vmem:[%s1273_s6 + $0xc8] sm:$0xff] %v639_v28  ;;  %v596_v31 = vadd.f32 %v923_v29, %v1269_v44  ;;  %v660_v32 = vadd.f32 %v939_v30, %v1269_v44 }
 0x10c   : > { %v587_v33 = vpop.f32.mrf.mxu0  ;;  %v651_v34 = vpop.f32.mrf.mxu1 }
 0x10d   : > { %680 = vst [vmem:[%s1273_s6 + $0x70] sm:$0xff] %v596_v31  ;;  %696 = vst [vmem:[%s1273_s6 + $0xf0] sm:$0xff] %v660_v32  ;;  %v588_v35 = vadd.f32 %v1269_v44, %v587_v33  ;;  %v652_v36 = vadd.f32 %v1269_v44, %v651_v34 }
 0x10e   : > { %v924_v37 = vpop.f32.mrf.mxu0  ;;  %v940_v38 = vpop.f32.mrf.mxu1 }
 0x10f   : > { %678 = vst [vmem:[%s1273_s6 + $0x60] sm:$0xff] %v588_v35  ;;  %694 = vst [vmem:[%s1273_s6 + $0xe0] sm:$0xff] %v652_v36  ;;  %v599_v39 = vadd.f32 %v924_v37, %v1269_v44  ;;  %v663_v40 = vadd.f32 %v940_v38, %v1269_v44 }
 0x110   : > { %v590_v41 = vpop.f32.mrf.mxu0  ;;  %v654_v42 = vpop.f32.mrf.mxu1 }
 0x111   : > { %681 = vst [vmem:[%s1273_s6 + $0x78] sm:$0xff] %v599_v39  ;;  %697 = vst [vmem:[%s1273_s6 + $0xf8] sm:$0xff] %v663_v40  ;;  %v591_v43 = vadd.f32 %v1269_v44, %v590_v41  ;;  %v655_v45 = vadd.f32 %v1269_v44, %v654_v42 }
 0x113   : > { %679 = vst [vmem:[%s1273_s6 + $0x68] sm:$0xff] %v591_v43  ;;  %695 = vst [vmem:[%s1273_s6 + $0xe8] sm:$0xff] %v655_v45 }
 0x114   : > { %1038 = shalt.err (!%p1035_p5)
}
 0x115   : > { %s1039_s24 = scalar_lea.hbm %s1336_s10, 4096  ;;  %s1043_s26 = scalar_lea.hbm %s1397_s4, 8192 }
 0x116   : > { %p1040_p6 = scmp.ne.s32.totalorder %s1336_s10, %s1039_s24  ;;  %p1044_p10 = scmp.lt.s32.totalorder %s1336_s10, %s1397_s4 }
 0x117   : > { %p1045_p11 = scmp.lt.s32.totalorder %s1043_s26, %s1039_s24 }
 0x118   : > { %p1041_p7 = pnand %p1040_p6, %p1171_p4 }
 0x119   : > { %p1046_p12 = por %p1045_p11, %p1044_p10 }
 0x11a   : > { %p1042_p9 = pneg %p1041_p7 }
 0x11c   : > { %p1047_p13 = pnand %p1046_p12, %p1042_p9 }
 0x11e   : > { %1050 = shalt.err (!%p1047_p13)
}
 0x11f   : > { %s1104_s6 = smov 128   ;;  %s1105_s29 = smov 8  }
 0x120   : > { %949 = dma.vmem_to_hbm [thread:$0]  (%p1171_p4), %s1338_s7, 4096, %s1336_s10, %s1348_s18, %s1104_s6, %s1104_s6, %s1105_s29  }
 0x121 PF: > { %p955_p0 = scmp.ge.s32.totalorder %s1101_s20, 2  ;;  %s729_s8 = sand.u32 1, %s1081_s15  }
 0x122   : > { %s730_s9 = scalar_lea.sflag [#allocation4], %s729_s8 }
 0x123   : > { %p952_p1 = pnand %p955_p0, %p1178_p8 }
 0x125   : > { %p953_p2 = pneg %p952_p1 }
 0x127   : > { %1076 = dma.done.wait (%p953_p2), %s730_s9, 4096  }
 0x128   : > { %1078 = vsyncadd (%p953_p2), %s730_s9, 4294963200  ;;  %s17_s20 = sadd.s32 1, %s1101_s20   ;;  %s1400_s15 = smov %s1085_s16 }
 0x129   : > { %p14_p3 = scmp.ge.s32.totalorder %s17_s20, 4   ;;  %s1401_s16 = smov %s1089_s17 }
 0x12a   : > { %s1402_s17 = smov %s1184_s28  ;;  %s1403_s18 = smov %s1097_s19 }
 0x12b   : > { %s1404_s19 = smov %s1406_s23  ;;  %16 = sbr.rel (!%p14_p3) target bundleno = 4 (0x4), region = 81 }
 0x130   :  { %735 = vsyncpa [#allocation4], 1 }
 0x131   :  { %737 = vsyncpa [#allocation4 + $0x1], 1 }

</bundles_post_ra>
